<compile_context>
chip_gen: v7x
topology: tpu7x:2x2x1
jax: 0.10.0
libtpu: 0.0.40
codegen_flags: <defaults>
</compile_context>

<pallas_src>
import functools

import jax
import jax.numpy as jnp
from jax.experimental import pallas as pl
from jax.experimental.pallas import tpu as pltpu


def _round_up(x, m):
    return ((x + m - 1) // m) * m


def _vmem_capacity_bytes():
    """Physical VMEM per TensorCore (v5e/v6e: 128 MiB, v7x: 64 MiB)."""
    try:
        info = pltpu.get_tpu_info()
        cap = int(getattr(info, "vmem_capacity_bytes", 0) or 0)
        if cap > 0:
            return cap
    except Exception:
        pass
    return 64 << 20  # conservative fallback = smallest current generation (v7x)


def _codebook_kernel(idx_ref, emb_ref, out_ref, *, k_chunk, compute_dtype):
    """out_tile = onehot(idx_tile) @ emb_block, chunked over the K dimension.

    idx_ref: (TN, 1)  int32 tile of flattened indices
    emb_ref: (Kp, TD) embedding table (whole resident table or one D block)
    out_ref: (TN, TD) output tile (lane-dense: TD is D or a multiple of 128)
    """
    idx = idx_ref[...]                            # (TN, 1)
    tn = idx.shape[0]
    kp = emb_ref.shape[0]
    num_chunks = kp // k_chunk                    # exact by construction

    def chunk_dot(c):
        base = c * k_chunk
        col = base + jax.lax.broadcasted_iota(jnp.int32, (tn, k_chunk), 1)
        onehot = (idx == col).astype(compute_dtype)          # exact 0/1 rows
        emb_c = emb_ref[pl.ds(base, k_chunk), :].astype(compute_dtype)
        return jnp.dot(onehot, emb_c, preferred_element_type=jnp.float32)

    acc = chunk_dot(0)
    for c in range(1, num_chunks):                # static unroll, small count
        acc = acc + chunk_dot(c)
    out_ref[...] = acc.astype(out_ref.dtype)


def codebook_lookup(indices, embedding_table, *, tile_n=None, tile_d=None):
    """indices: int array, any shape. embedding_table: (K, D)."""
    K, D = embedding_table.shape
    orig_shape = indices.shape
    out_dtype = embedding_table.dtype
    itemsize = jnp.dtype(out_dtype).itemsize

    # MXU compute dtype: v7x has no integer MXU path, so integer codebooks are
    # matmul'd in f32 (exact for |x| < 2^24) and cast back to the table dtype.
    if jnp.issubdtype(out_dtype, jnp.floating):
        compute_dtype = out_dtype
    else:
        compute_dtype = jnp.float32

    flat = indices.reshape(-1).astype(jnp.int32)
    N = flat.shape[0]

    vmem_cap = _vmem_capacity_bytes()
    vmem_budget = int(0.85 * vmem_cap)

    # ---- pad K to the MXU contraction width and pick the in-kernel K chunk --
    # Zero-padded rows can never be selected (valid indices are < K), so the
    # result is unchanged; 256 covers v5e's 128x128 and v6e/v7x's 256x256 MXU.
    Kp = _round_up(max(K, 1), 256)
    num_k_chunks = pl.cdiv(Kp, 2048)          # bound the (tile_n, k_chunk) onehot
    k_chunk = _round_up(pl.cdiv(Kp, num_k_chunks), 256)
    Kp = k_chunk * num_k_chunks

    # ---- choose tile_d: resident whole table vs D-split ----------------------
    if tile_d is None:
        if Kp * D * itemsize <= int(0.40 * vmem_cap):
            tile_d = D                        # resident table, zero per-step DMA
        else:
            tile_d = max(128, ((8 << 20) // (Kp * itemsize)) // 128 * 128)
            tile_d = min(tile_d, D)
    tile_d = min(tile_d, D)
    if tile_d < D:
        tile_d = max(128, (tile_d // 128) * 128)
        if tile_d >= D:
            tile_d = D
    split_d = tile_d < D
    D_pad = _round_up(D, tile_d) if split_d else D

    # Resident table is single-buffered (memory_space=VMEM); the D-split table
    # block is a pipelined BlockSpec and therefore double-buffered.
    table_bytes = (2 if split_d else 1) * Kp * tile_d * itemsize

    # ---- choose tile_n --------------------------------------------------------
    if tile_n is None:
        cap_onehot = ((4 << 20) // (k_chunk * 4)) // 256 * 256
        cap_out = ((8 << 20) // (2 * tile_d * itemsize)) // 256 * 256
        tile_n = min(4096, max(256, cap_onehot), max(256, cap_out),
                     _round_up(max(N, 1), 256))
    tile_n = max(256, _round_up(tile_n, 256))

    def _needed(tn):
        return (table_bytes
                + 2 * tn * tile_d * itemsize     # double-buffered output tiles
                + 2 * tn * 128 * 4               # (tn,1) idx tiles lane-pad to 128
                + tn * k_chunk * 4               # onehot chunk temporary
                + tn * tile_d * 4)               # f32 accumulator / MXU result

    # Shrink tile_n until the whole working set fits the per-TC VMEM budget.
    while tile_n > 256 and int(_needed(tile_n) * 1.2) + (4 << 20) > vmem_budget:
        tile_n = max(256, (tile_n // 2) // 256 * 256)

    vmem_limit = int(_needed(tile_n) * 1.2) + (4 << 20)
    vmem_limit = min(max(vmem_limit, 32 << 20), vmem_budget)

    # ---- pad operands ---------------------------------------------------------
    pad_n = (-N) % tile_n
    if pad_n:
        flat = jnp.concatenate([flat, jnp.zeros((pad_n,), jnp.int32)])
    Np = flat.shape[0]
    flat2d = flat.reshape(Np, 1)

    emb = embedding_table
    if Kp > K or D_pad > D:
        emb = jnp.pad(emb, ((0, Kp - K), (0, D_pad - D)))

    kernel = functools.partial(_codebook_kernel, k_chunk=k_chunk,
                               compute_dtype=compute_dtype)

    if not split_d:
        # Single grid axis over N; full table resident once in VMEM (no per-step
        # table DMA, no 2x double-buffer footprint) -- the v5e/v6e fast path.
        grid = (Np // tile_n,)
        in_specs = [
            pl.BlockSpec((tile_n, 1), lambda i: (i, 0)),
            pl.BlockSpec(memory_space=pltpu.MemorySpace.VMEM),
        ]
        out_specs = pl.BlockSpec((tile_n, D_pad), lambda i: (i, 0))
        dim_sem = ("parallel",)
    else:
        # D axis outer, N axis inner: the (Kp, tile_d) table block index is
        # constant across the inner N steps, so Pallas revisits it without
        # re-DMA.  Bounds the resident footprint for v7x's 64 MiB VMEM.
        grid = (D_pad // tile_d, Np // tile_n)
        in_specs = [
            pl.BlockSpec((tile_n, 1), lambda d, n: (n, 0)),
            pl.BlockSpec((Kp, tile_d), lambda d, n: (0, d)),
        ]
        out_specs = pl.BlockSpec((tile_n, tile_d), lambda d, n: (n, d))
        dim_sem = ("parallel", "parallel")

    out = pl.pallas_call(
        kernel,
        out_shape=jax.ShapeDtypeStruct((Np, D_pad), out_dtype),
        grid_spec=pltpu.PrefetchScalarGridSpec(
            num_scalar_prefetch=0,
            grid=grid,
            in_specs=in_specs,
            out_specs=out_specs,
        ),
        compiler_params=pltpu.CompilerParams(
            dimension_semantics=dim_sem,
            vmem_limit_bytes=vmem_limit,
        ),
    )(flat2d, emb)

    out = out[:N, :D]
    return out.reshape(*orig_shape, D)


if __name__ == "__main__":
    # Deterministic synthetic parameters / inputs (nn.Embedding default: N(0,1)).
    num_embeddings = 64
    embedding_dim = 128

    key = jax.random.PRNGKey(0)
    k_emb, k_idx, k_emb2, k_idx2 = jax.random.split(key, 4)

    embedding_table = jax.random.normal(
        k_emb, (num_embeddings, embedding_dim), dtype=jnp.float32
    )
    # Small index tensor, e.g. a 2x8x8 latent code grid.
    indices = jax.random.randint(
        k_idx, (2, 8, 8), minval=0, maxval=num_embeddings, dtype=jnp.int32
    )

    out = jax.block_until_ready(codebook_lookup(indices, embedding_table))
    ref = embedding_table[indices]
    assert out.shape == (2, 8, 8, embedding_dim), out.shape
    assert jnp.array_equal(out, ref), "mismatch vs gather reference (resident path)"

    # Also exercise the D-split (pipelined table block) path used for large
    # codebooks on v7x's 64 MiB VMEM, forced here at a small size via tile_d.
    table2 = jax.random.normal(k_emb2, (48, 256), dtype=jnp.float32)
    idx2 = jax.random.randint(k_idx2, (4, 16), minval=0, maxval=48, dtype=jnp.int32)
    out2 = jax.block_until_ready(codebook_lookup(idx2, table2, tile_d=128))
    assert out2.shape == (4, 16, 256), out2.shape
    assert jnp.array_equal(out2, table2[idx2]), "mismatch vs gather reference (D-split path)"

    print("KERNEL_OK")
</pallas_src>

<mosaic_0001>
module attributes {stable_mosaic.version = 11 : i64} {
  func.func @_codebook_kernel(%arg0: i32, %arg1: memref<256x1xi32, #tpu.memory_space<vmem>>, %arg2: memref<256x128xf32, #tpu.memory_space<vmem>>, %arg3: memref<256x128xf32, #tpu.memory_space<vmem>>) attributes {dimension_semantics = [#tpu.dimension_semantics<parallel>], iteration_bounds = array<i64: 1>, scalar_prefetch = 0 : i64, scratch_operands = 0 : i64, tpu.core_type = #tpu.core_type<tc>, window_params = [{transform_indices = @transform_0, window_bounds = array<i64: 256, 1>}, {pipeline_mode = #tpu.pipeline_mode<synchronous>, transform_indices = @transform_1, window_bounds = array<i64: 256, 128>}, {transform_indices = @transform_2, window_bounds = array<i64: 256, 128>}]} {
    %c0 = arith.constant 0 : index
    %c0_0 = arith.constant 0 : index
    %0 = vector.load %arg1[%c0, %c0_0] : memref<256x1xi32, #tpu.memory_space<vmem>>, vector<256x1xi32>
    %1 = tpu.iota {dimensions = array<i32: 1>} : vector<256x256xi32>
    %c0_i32 = arith.constant 0 : i32
    %2 = vector.broadcast %c0_i32 : i32 to vector<256x256xi32>
    %3 = arith.addi %2, %1 : vector<256x256xi32>
    %4 = vector.broadcast %0 : vector<256x1xi32> to vector<256x256xi32>
    %5 = arith.cmpi eq, %4, %3 : vector<256x256xi32>
    %6 = arith.extui %5 : vector<256x256xi1> to vector<256x256xi32>
    %7 = arith.sitofp %6 : vector<256x256xi32> to vector<256x256xf32>
    %c0_1 = arith.constant 0 : index
    %c0_2 = arith.constant 0 : index
    %8 = vector.load %arg2[%c0_1, %c0_2] : memref<256x128xf32, #tpu.memory_space<vmem>>, vector<256x128xf32>
    %cst = arith.constant dense<0.000000e+00> : vector<256x128xf32>
    %9 = tpu.matmul %7, %8, %cst {dimension_numbers = #tpu.dot_dimension_numbers<[1], [0], [0], [1], [0, 0, 1, 1], [], []>} : vector<256x256xf32>, vector<256x128xf32>, vector<256x128xf32> -> vector<256x128xf32>
    %c0_3 = arith.constant 0 : index
    %c0_4 = arith.constant 0 : index
    %10 = vector.load %arg3[%c0_3, %c0_4] : memref<256x128xf32, #tpu.memory_space<vmem>>, vector<256x128xf32>
    tpu.vector_store %arg3[%c0_3, %c0_4], %9 {strides = array<i32>} : memref<256x128xf32, #tpu.memory_space<vmem>>, vector<256x128xf32>,
    return
  }
  func.func @transform_0(%arg0: i32) -> (i32, i32) {
    %c0_i32 = arith.constant 0 : i32
    %c0_i32_0 = arith.constant 0 : i32
    return %arg0, %c0_i32 : i32, i32
  }
  func.func @transform_1(%arg0: i32) -> (i32, i32) {
    %c0_i32 = arith.constant 0 : i32
    %c0_i32_0 = arith.constant 0 : i32
    %c0_i32_1 = arith.constant 0 : i32
    return %c0_i32, %c0_i32_0 : i32, i32
  }
  func.func @transform_2(%arg0: i32) -> (i32, i32) {
    %c0_i32 = arith.constant 0 : i32
    %c0_i32_0 = arith.constant 0 : i32
    return %arg0, %c0_i32 : i32, i32
  }
}

</mosaic_0001>

<bundles_post_ra>
// kernel: tpu_custom_call.1
= control target key start
LH: loop header
LB: loop body
LE: loop exit
PB: predicated region body
PF: predicated region fallthrough
CT: control target
= control target key end

     0   :  { %v880_v2 = vmov 0   ;;  %v881_v5 = vmov 0.0|0.0   ;;  %s1270_s0 = inlined_call_operand.vmem [shape: s32[256,1], index: 0, kind: input, shape index: {}]   ;;  %s1271_s1 = inlined_call_operand.vmem [shape: f32[256,128], index: 1, kind: input, shape index: {}]   ;;  %s1272_s2 = inlined_call_operand.hbm [shape: f32[256,128], index: 2, kind: output, shape index: {}]  }
   0x1   :  { %v13_v0 = vld [vmem:[%s1270_s0 + $0x8] sm:$0xff]  ;;  %v12_v1 = vld [vmem:[%s1270_s0] sm:$0xff]  ;;  %855 = vset.pattern.permute.xlu1 %v880_v2  ;;  %854 = vset.pattern.permute.xlu0 %v880_v2  ;;  %v30_v6 = vld [vmem:[%s1270_s0 + $0x90] sm:$0xff] }
   0x2   :  { %51 = vperm.xlu1 %855, %v13_v0   ;;  %48 = vperm.xlu0 %854, %v12_v1   ;;  %v29_v3 = vld [vmem:[%s1270_s0 + $0x88] sm:$0xff]  ;;  %v28_v4 = vld [vmem:[%s1270_s0 + $0x80] sm:$0xff]  ;;  %v14_v7 = vld [vmem:[%s1270_s0 + $0x10] sm:$0xff] }
   0x3   :  { %768 = vmatprep.subr.bf16.mxu0 %v881_v5  ;;  %816 = vmatprep.subr.bf16.mxu1 %v881_v5  ;;  %v335_v8 = vld [vmem:[%s1271_s1] sm:$0xff]  ;;  %v31_v9 = vld [vmem:[%s1270_s0 + $0x98] sm:$0xff]  ;;  %v336_v11 = vld [vmem:[%s1271_s1 + $0x8] sm:$0xff] }
   0x4   :  { %v15_v10 = vld [vmem:[%s1270_s0 + $0x18] sm:$0xff]  ;;  %v769_v12 = vpack.c.bf16 %v336_v11, %v335_v8  ;;  %v337_v13 = vld [vmem:[%s1271_s1 + $0x10] sm:$0xff]  ;;  %v32_v15 = vld [vmem:[%s1270_s0 + $0xa0] sm:$0xff] }
   0x5   :  { %v338_v14 = vld [vmem:[%s1271_s1 + $0x18] sm:$0xff]  ;;  %v16_v16 = vld [vmem:[%s1270_s0 + $0x20] sm:$0xff]  ;;  %v340_v19 = vld [vmem:[%s1271_s1 + $0x28] sm:$0xff] }
   0x6   :  { %99 = vperm.xlu1 %855, %v29_v3   ;;  %96 = vperm.xlu0 %854, %v28_v4   ;;  %v772_v17 = vpack.c.bf16 %v338_v14, %v337_v13  ;;  %v339_v18 = vld [vmem:[%s1271_s1 + $0x20] sm:$0xff]  ;;  %v33_v20 = vld [vmem:[%s1270_s0 + $0xa8] sm:$0xff]  ;;  %v341_v23 = vld [vmem:[%s1271_s1 + $0x30] sm:$0xff] }
   0x7   :  { %770 = vmatpush1.bf16.msra.mxu0 %v769_v12  ;;  %832 = vmatpush1.bf16.msra.mxu1 %v769_v12  ;;  %v17_v21 = vld [vmem:[%s1270_s0 + $0x28] sm:$0xff]  ;;  %v775_v22 = vpack.c.bf16 %v340_v19, %v339_v18  ;;  %v342_v24 = vld [vmem:[%s1271_s1 + $0x38] sm:$0xff] }
   0x8   :  { %771 = vmatprep.subr.bf16.mxu0 %v881_v5  ;;  %817 = vmatprep.subr.bf16.mxu1 %v881_v5 }
   0xa   :  { %102 = vperm.xlu1 %855, %v30_v6   ;;  %54 = vperm.xlu0 %854, %v14_v7  }
   0xb   :  { %773 = vmatpush1.bf16.msra.mxu0 %v772_v17  ;;  %833 = vmatpush1.bf16.msra.mxu1 %v772_v17 }
   0xc   :  { %774 = vmatprep.subr.bf16.mxu0 %v881_v5  ;;  %818 = vmatprep.subr.bf16.mxu1 %v881_v5 }
   0xe   :  { %105 = vperm.xlu1 %855, %v31_v9   ;;  %57 = vperm.xlu0 %854, %v15_v10  }
  0x12   :  { %108 = vperm.xlu1 %855, %v32_v15   ;;  %60 = vperm.xlu0 %854, %v16_v16  }
  0x13   :  { %7 = vsyncpa [#allocation3], 0  ;;  %v34_v25 = vld [vmem:[%s1270_s0 + $0xb0] sm:$0xff]  ;;  %776 = vmatpush1.bf16.msra.mxu0 %v775_v22  ;;  %834 = vmatpush1.bf16.msra.mxu1 %v775_v22  ;;  %v778_v27 = vpack.c.bf16 %v342_v24, %v341_v23  ;;  %v343_v28 = vld [vmem:[%s1271_s1 + $0x40] sm:$0xff]  ;;  %v44_v19 = vlaneseq  ;;  %v882_v24 = vmov 1.0  }
  0x14   :  { %v18_v26 = vld [vmem:[%s1270_s0 + $0x30] sm:$0xff]  ;;  %777 = vmatprep.subr.bf16.mxu0 %v881_v5  ;;  %819 = vmatprep.subr.bf16.mxu1 %v881_v5  ;;  %v344_v29 = vld [vmem:[%s1271_s1 + $0x48] sm:$0xff]  ;;  %v35_v30 = vld [vmem:[%s1270_s0 + $0xb8] sm:$0xff] }
  0x15   :  { %v19_v31 = vld [vmem:[%s1270_s0 + $0x38] sm:$0xff]  ;;  %v781_v32 = vpack.c.bf16 %v344_v29, %v343_v28  ;;  %v345_v33 = vld [vmem:[%s1271_s1 + $0x50] sm:$0xff]  ;;  %v36_v35 = vld [vmem:[%s1270_s0 + $0xc0] sm:$0xff] }
  0x16   :  { %111 = vperm.xlu1 %855, %v33_v20   ;;  %63 = vperm.xlu0 %854, %v17_v21   ;;  %v346_v34 = vld [vmem:[%s1271_s1 + $0x58] sm:$0xff]  ;;  %v20_v36 = vld [vmem:[%s1270_s0 + $0x40] sm:$0xff]  ;;  %v348_v39 = vld [vmem:[%s1271_s1 + $0x68] sm:$0xff]  ;;  %v1125_v20 = vand.u32 127, %v44_v19 }
  0x17   :  { %779 = vmatpush1.bf16.msra.mxu0 %v778_v27  ;;  %835 = vmatpush1.bf16.msra.mxu1 %v778_v27  ;;  %v784_v37 = vpack.c.bf16 %v346_v34, %v345_v33  ;;  %v347_v38 = vld [vmem:[%s1271_s1 + $0x60] sm:$0xff]  ;;  %v37_v40 = vld [vmem:[%s1270_s0 + $0xc8] sm:$0xff]  ;;  %v349_v43 = vld [vmem:[%s1271_s1 + $0x70] sm:$0xff] }
  0x18   :  { %780 = vmatprep.subr.bf16.mxu0 %v881_v5  ;;  %820 = vmatprep.subr.bf16.mxu1 %v881_v5  ;;  %v21_v41 = vld [vmem:[%s1270_s0 + $0x48] sm:$0xff]  ;;  %v787_v42 = vpack.c.bf16 %v348_v39, %v347_v38  ;;  %v350_v44 = vld [vmem:[%s1271_s1 + $0x78] sm:$0xff]  ;;  %v38_v45 = vld [vmem:[%s1270_s0 + $0xd0] sm:$0xff]  ;;  %v1128_v21 = vadd.s32 128, %v1125_v20 }
  0x19   :  { %v22_v46 = vld [vmem:[%s1270_s0 + $0x50] sm:$0xff]  ;;  %v790_v47 = vpack.c.bf16 %v350_v44, %v349_v43  ;;  %v351_v48 = vld [vmem:[%s1271_s1 + $0x80] sm:$0xff]  ;;  %v352_v49 = vld [vmem:[%s1271_s1 + $0x88] sm:$0xff] }
  0x1a   :  { %114 = vperm.xlu1 %855, %v34_v25   ;;  %66 = vperm.xlu0 %854, %v18_v26   ;;  %v39_v50 = vld [vmem:[%s1270_s0 + $0xd8] sm:$0xff]  ;;  %v793_v52 = vpack.c.bf16 %v352_v49, %v351_v48  ;;  %v353_v53 = vld [vmem:[%s1271_s1 + $0x90] sm:$0xff]  ;;  %v40_v55 = vld [vmem:[%s1270_s0 + $0xe0] sm:$0xff] }
  0x1b   :  { %782 = vmatpush1.bf16.msra.mxu0 %v781_v32  ;;  %836 = vmatpush1.bf16.msra.mxu1 %v781_v32  ;;  %v23_v51 = vld [vmem:[%s1270_s0 + $0x58] sm:$0xff]  ;;  %v24_v56 = vld [vmem:[%s1270_s0 + $0x60] sm:$0xff]  ;;  %v356_v59 = vld [vmem:[%s1271_s1 + $0xa8] sm:$0xff] }
  0x1c   :  { %783 = vmatprep.subr.bf16.mxu0 %v881_v5  ;;  %821 = vmatprep.subr.bf16.mxu1 %v881_v5  ;;  %v354_v54 = vld [vmem:[%s1271_s1 + $0x98] sm:$0xff]  ;;  %v355_v58 = vld [vmem:[%s1271_s1 + $0xa0] sm:$0xff]  ;;  %v41_v60 = vld [vmem:[%s1270_s0 + $0xe8] sm:$0xff] }
  0x1d   :  { %v796_v57 = vpack.c.bf16 %v354_v54, %v353_v53  ;;  %v25_v61 = vld [vmem:[%s1270_s0 + $0x68] sm:$0xff]  ;;  %v799_v62 = vpack.c.bf16 %v356_v59, %v355_v58  ;;  %v357_v63 = vld [vmem:[%s1271_s1 + $0xb0] sm:$0xff]  ;;  %v358_v0 = vld [vmem:[%s1271_s1 + $0xb8] sm:$0xff] }
  0x1e   :  { %117 = vperm.xlu1 %855, %v35_v30   ;;  %69 = vperm.xlu0 %854, %v19_v31   ;;  %v42_v1 = vld [vmem:[%s1270_s0 + $0xf0] sm:$0xff]  ;;  %v802_v3 = vpack.c.bf16 %v358_v0, %v357_v63  ;;  %v359_v4 = vld [vmem:[%s1271_s1 + $0xc0] sm:$0xff]  ;;  %v360_v6 = vld [vmem:[%s1271_s1 + $0xc8] sm:$0xff] }
  0x1f   :  { %785 = vmatpush1.bf16.msra.mxu0 %v784_v37  ;;  %837 = vmatpush1.bf16.msra.mxu1 %v784_v37  ;;  %v26_v2 = vld [vmem:[%s1270_s0 + $0x70] sm:$0xff]  ;;  %v43_v7 = vld [vmem:[%s1270_s0 + $0xf8] sm:$0xff]  ;;  %v805_v9 = vpack.c.bf16 %v360_v6, %v359_v4  ;;  %v363_v13 = vld [vmem:[%s1271_s1 + $0xe0] sm:$0xff] }
  0x20   :  { %786 = vmatprep.subr.bf16.mxu0 %v881_v5  ;;  %822 = vmatprep.subr.bf16.mxu1 %v881_v5  ;;  %v27_v8 = vld [vmem:[%s1270_s0 + $0x78] sm:$0xff]  ;;  %v361_v10 = vld [vmem:[%s1271_s1 + $0xd0] sm:$0xff]  ;;  %v364_v14 = vld [vmem:[%s1271_s1 + $0xe8] sm:$0xff] }
  0x21   :  { %v362_v11 = vld [vmem:[%s1271_s1 + $0xd8] sm:$0xff]  ;;  %v811_v15 = vpack.c.bf16 %v364_v14, %v363_v13  ;;  %v365_v16 = vld [vmem:[%s1271_s1 + $0xf0] sm:$0xff] }
  0x22   :  { %120 = vperm.xlu1 %855, %v36_v35   ;;  %72 = vperm.xlu0 %854, %v20_v36   ;;  %v808_v12 = vpack.c.bf16 %v362_v11, %v361_v10  ;;  %v366_v17 = vld [vmem:[%s1271_s1 + $0xf8] sm:$0xff]  ;;  %s883_s1 = smov [#allocation2]  }
  0x23   :  { %788 = vmatpush1.bf16.msra.mxu0 %v787_v42  ;;  %838 = vmatpush1.bf16.msra.mxu1 %v787_v42  ;;  %v814_v18 = vpack.c.bf16 %v366_v17, %v365_v16  ;;  %s629_s24 = sshll.u32 %s883_s1, 4  ;;  %s630_s24 = int_to_ptr.vmem [resolvable:$true] %s629_s24 }
  0x24   :  { %789 = vmatprep.subr.bf16.mxu0 %v881_v5  ;;  %823 = vmatprep.subr.bf16.mxu1 %v881_v5  ;;  %s856_s25 = scalar_lea.vmem %s630_s24, 4096  ;;  %p861_p1 = scmp.lt.s32.totalorder %s630_s24, %s630_s24 }
  0x25   :  { %p857_p0 = scmp.ne.s32.totalorder %s630_s24, %s856_s25  ;;  %p862_p2 = scmp.lt.s32.totalorder %s856_s25, %s856_s25 }
  0x26   :  { %123 = vperm.xlu1 %855, %v37_v40   ;;  %75 = vperm.xlu0 %854, %v21_v41  }
  0x27   :  { %791 = vmatpush1.bf16.msra.mxu0 %v790_v47  ;;  %839 = vmatpush1.bf16.msra.mxu1 %v790_v47  ;;  %p863_p3 = por %p862_p2, %p861_p1 }
  0x28   :  { %792 = vmatprep.subr.bf16.mxu0 %v881_v5  ;;  %824 = vmatprep.subr.bf16.mxu1 %v881_v5 }
  0x29   :  { %p864_p4 = pnand %p863_p3, %p857_p0 }
  0x2a   :  { %126 = vperm.xlu1 %855, %v38_v45   ;;  %78 = vperm.xlu0 %854, %v22_v46  }
  0x2b   :  { %794 = vmatpush1.bf16.msra.mxu0 %v793_v52  ;;  %840 = vmatpush1.bf16.msra.mxu1 %v793_v52 }
  0x2c   :  { %795 = vmatprep.subr.bf16.mxu0 %v881_v5  ;;  %825 = vmatprep.subr.bf16.mxu1 %v881_v5 }
  0x2e   :  { %129 = vperm.xlu1 %855, %v39_v50   ;;  %81 = vperm.xlu0 %854, %v23_v51  }
  0x2f   :  { %797 = vmatpush1.bf16.msra.mxu0 %v796_v57  ;;  %841 = vmatpush1.bf16.msra.mxu1 %v796_v57 }
  0x30   :  { %798 = vmatprep.subr.bf16.mxu0 %v881_v5  ;;  %826 = vmatprep.subr.bf16.mxu1 %v881_v5 }
  0x32   :  { %132 = vperm.xlu1 %855, %v40_v55   ;;  %84 = vperm.xlu0 %854, %v24_v56  }
  0x33   :  { %800 = vmatpush1.bf16.msra.mxu0 %v799_v62  ;;  %842 = vmatpush1.bf16.msra.mxu1 %v799_v62 }
  0x34   :  { %801 = vmatprep.subr.bf16.mxu0 %v881_v5  ;;  %827 = vmatprep.subr.bf16.mxu1 %v881_v5 }
  0x36   :  { %135 = vperm.xlu1 %855, %v41_v60   ;;  %87 = vperm.xlu0 %854, %v25_v61  }
  0x37   :  { %803 = vmatpush1.bf16.msra.mxu0 %v802_v3  ;;  %843 = vmatpush1.bf16.msra.mxu1 %v802_v3 }
  0x38   :  { %804 = vmatprep.subr.bf16.mxu0 %v881_v5  ;;  %828 = vmatprep.subr.bf16.mxu1 %v881_v5 }
  0x3a   :  { %138 = vperm.xlu1 %855, %v42_v1   ;;  %90 = vperm.xlu0 %854, %v26_v2  }
  0x3b   :  { %806 = vmatpush1.bf16.msra.mxu0 %v805_v9  ;;  %844 = vmatpush1.bf16.msra.mxu1 %v805_v9 }
  0x3c   :  { %807 = vmatprep.subr.bf16.mxu0 %v881_v5  ;;  %829 = vmatprep.subr.bf16.mxu1 %v881_v5 }
  0x3e   :  { %141 = vperm.xlu1 %855, %v43_v7   ;;  %93 = vperm.xlu0 %854, %v27_v8  }
  0x3f   :  { %809 = vmatpush1.bf16.msra.mxu0 %v808_v12  ;;  %845 = vmatpush1.bf16.msra.mxu1 %v808_v12 }
  0x40   :  { %810 = vmatprep.subr.bf16.mxu0 %v881_v5  ;;  %830 = vmatprep.subr.bf16.mxu1 %v881_v5 }
  0x43   :  { %812 = vmatpush1.bf16.msra.mxu0 %v811_v15  ;;  %846 = vmatpush1.bf16.msra.mxu1 %v811_v15 }
  0x44   :  { %813 = vmatprep.subr.bf16.mxu0 %v881_v5  ;;  %831 = vmatprep.subr.bf16.mxu1 %v881_v5 }
  0x47   :  { %815 = vmatpush1.bf16.msra.mxu0 %v814_v18  ;;  %847 = vmatpush1.bf16.msra.mxu1 %v814_v18 }
  0x81   :  { %v52_v22 = vpop.permute.xlu1 %51  ;;  %v49_v23 = vpop.permute.xlu0 %48 }
  0x82   :  { %vm146_vm0 = vcmp.eq.s32.totalorder %v52_v22, %v1128_v21  ;;  %vm143_vm1 = vcmp.eq.s32.totalorder %v49_v23, %v1125_v20  ;;  %vm144_vm2 = vcmp.eq.s32.totalorder %v49_v23, %v1128_v21  ;;  %vm145_vm3 = vcmp.eq.s32.totalorder %v52_v22, %v1125_v20 }
  0x83   :  { %704 = vmatprep.mubr.msk.f32.mxu0 %vm144_vm2, %v882_v24 }
  0x84   :  { %705 = vmatmul.mubr.msk.f32.vlgmr.msra.gmra.mrb[0].mxu0 %vm143_vm1, %v882_v24 }
  0x85   :  { %v100_v5 = vpop.permute.xlu1 %99  ;;  %v97_v25 = vpop.permute.xlu0 %96  ;;  %706 = vmatprep.mubr.msk.f32.mxu0 %vm146_vm0, %v882_v24 }
  0x86   :  { %vm175_vm4 = vcmp.eq.s32.totalorder %v97_v25, %v1125_v20  ;;  %vm176_vm5 = vcmp.eq.s32.totalorder %v97_v25, %v1128_v21  ;;  %vm178_vm6 = vcmp.eq.s32.totalorder %v100_v5, %v1128_v21  ;;  %vm177_vm9 = vcmp.eq.s32.totalorder %v100_v5, %v1125_v20 }
  0x87   :  { %736 = vmatprep.mubr.msk.f32.mxu1 %vm176_vm5, %v882_v24 }
  0x88   :  { %707 = vmatmul.mubr.msk.f32.gmra.mrb[2].mxu0 %vm145_vm3, %v882_v24  ;;  %737 = vmatmul.mubr.msk.f32.vlgmr.msra.gmra.mrb[0].mxu1 %vm175_vm4, %v882_v24 }
  0x89   :  { %v103_v26 = vpop.permute.xlu1 %102  ;;  %738 = vmatprep.mubr.msk.f32.mxu1 %vm178_vm6, %v882_v24  ;;  %v55_v27 = vpop.permute.xlu0 %54 }
  0x8a   :  { %vm147_vm7 = vcmp.eq.s32.totalorder %v55_v27, %v1125_v20  ;;  %vm148_vm8 = vcmp.eq.s32.totalorder %v55_v27, %v1128_v21  ;;  %vm180_vm10 = vcmp.eq.s32.totalorder %v103_v26, %v1128_v21  ;;  %vm179_vm13 = vcmp.eq.s32.totalorder %v103_v26, %v1125_v20 }
  0x8b   :  { %708 = vmatprep.mubr.msk.f32.mxu0 %vm148_vm8, %v882_v24 }
  0x8c   :  { %709 = vmatmul.mubr.msk.f32.gmra.mrb[4].mxu0 %vm147_vm7, %v882_v24  ;;  %739 = vmatmul.mubr.msk.f32.gmra.mrb[2].mxu1 %vm177_vm9, %v882_v24 }
  0x8d   :  { %v106_v28 = vpop.permute.xlu1 %105  ;;  %740 = vmatprep.mubr.msk.f32.mxu1 %vm180_vm10, %v882_v24  ;;  %v58_v29 = vpop.permute.xlu0 %57 }
  0x8e   :  { %vm149_vm11 = vcmp.eq.s32.totalorder %v58_v29, %v1125_v20  ;;  %vm150_vm12 = vcmp.eq.s32.totalorder %v58_v29, %v1128_v21  ;;  %vm182_vm14 = vcmp.eq.s32.totalorder %v106_v28, %v1128_v21  ;;  %vm181_vm1 = vcmp.eq.s32.totalorder %v106_v28, %v1125_v20 }
  0x8f   :  { %710 = vmatprep.mubr.msk.f32.mxu0 %vm150_vm12, %v882_v24 }
  0x90   :  { %711 = vmatmul.mubr.msk.f32.gmra.mrb[6].mxu0 %vm149_vm11, %v882_v24  ;;  %741 = vmatmul.mubr.msk.f32.gmra.mrb[4].mxu1 %vm179_vm13, %v882_v24 }
  0x91   :  { %v109_v30 = vpop.permute.xlu1 %108  ;;  %742 = vmatprep.mubr.msk.f32.mxu1 %vm182_vm14, %v882_v24  ;;  %v61_v31 = vpop.permute.xlu0 %60 }
  0x92   :  { %vm151_vm15 = vcmp.eq.s32.totalorder %v61_v31, %v1125_v20  ;;  %vm152_vm0 = vcmp.eq.s32.totalorder %v61_v31, %v1128_v21  ;;  %vm184_vm2 = vcmp.eq.s32.totalorder %v109_v30, %v1128_v21  ;;  %vm183_vm5 = vcmp.eq.s32.totalorder %v109_v30, %v1125_v20 }
  0x93   :  { %712 = vmatprep.mubr.msk.f32.mxu0 %vm152_vm0, %v882_v24 }
  0x94   :  { %713 = vmatmul.mubr.msk.f32.gmra.mrb[8].mxu0 %vm151_vm15, %v882_v24  ;;  %743 = vmatmul.mubr.msk.f32.gmra.mrb[6].mxu1 %vm181_vm1, %v882_v24 }
  0x95   :  { %v112_v32 = vpop.permute.xlu1 %111  ;;  %744 = vmatprep.mubr.msk.f32.mxu1 %vm184_vm2, %v882_v24  ;;  %v64_v33 = vpop.permute.xlu0 %63 }
  0x96   :  { %vm153_vm3 = vcmp.eq.s32.totalorder %v64_v33, %v1125_v20  ;;  %vm154_vm4 = vcmp.eq.s32.totalorder %v64_v33, %v1128_v21  ;;  %vm186_vm6 = vcmp.eq.s32.totalorder %v112_v32, %v1128_v21  ;;  %vm185_vm9 = vcmp.eq.s32.totalorder %v112_v32, %v1125_v20 }
  0x97   :  { %714 = vmatprep.mubr.msk.f32.mxu0 %vm154_vm4, %v882_v24 }
  0x98   :  { %715 = vmatmul.mubr.msk.f32.gmra.mrb[10].mxu0 %vm153_vm3, %v882_v24  ;;  %745 = vmatmul.mubr.msk.f32.gmra.mrb[8].mxu1 %vm183_vm5, %v882_v24 }
  0x99   :  { %v115_v34 = vpop.permute.xlu1 %114  ;;  %746 = vmatprep.mubr.msk.f32.mxu1 %vm186_vm6, %v882_v24  ;;  %v67_v35 = vpop.permute.xlu0 %66 }
  0x9a   :  { %vm155_vm7 = vcmp.eq.s32.totalorder %v67_v35, %v1125_v20  ;;  %vm156_vm8 = vcmp.eq.s32.totalorder %v67_v35, %v1128_v21  ;;  %vm188_vm10 = vcmp.eq.s32.totalorder %v115_v34, %v1128_v21  ;;  %vm187_vm13 = vcmp.eq.s32.totalorder %v115_v34, %v1125_v20 }
  0x9b   :  { %716 = vmatprep.mubr.msk.f32.mxu0 %vm156_vm8, %v882_v24 }
  0x9c   :  { %717 = vmatmul.mubr.msk.f32.gmra.mrb[12].mxu0 %vm155_vm7, %v882_v24  ;;  %747 = vmatmul.mubr.msk.f32.gmra.mrb[10].mxu1 %vm185_vm9, %v882_v24 }
  0x9d   :  { %v118_v36 = vpop.permute.xlu1 %117  ;;  %748 = vmatprep.mubr.msk.f32.mxu1 %vm188_vm10, %v882_v24  ;;  %v70_v37 = vpop.permute.xlu0 %69 }
  0x9e   :  { %vm157_vm11 = vcmp.eq.s32.totalorder %v70_v37, %v1125_v20  ;;  %vm158_vm12 = vcmp.eq.s32.totalorder %v70_v37, %v1128_v21  ;;  %vm190_vm14 = vcmp.eq.s32.totalorder %v118_v36, %v1128_v21  ;;  %vm189_vm1 = vcmp.eq.s32.totalorder %v118_v36, %v1125_v20 }
  0x9f   :  { %718 = vmatprep.mubr.msk.f32.mxu0 %vm158_vm12, %v882_v24 }
  0xa0   :  { %719 = vmatmul.mubr.msk.f32.gmra.mrb[14].mxu0 %vm157_vm11, %v882_v24  ;;  %749 = vmatmul.mubr.msk.f32.gmra.mrb[12].mxu1 %vm187_vm13, %v882_v24 }
  0xa1   :  { %v121_v38 = vpop.permute.xlu1 %120  ;;  %750 = vmatprep.mubr.msk.f32.mxu1 %vm190_vm14, %v882_v24  ;;  %v73_v39 = vpop.permute.xlu0 %72 }
  0xa2   :  { %vm159_vm15 = vcmp.eq.s32.totalorder %v73_v39, %v1125_v20  ;;  %vm160_vm0 = vcmp.eq.s32.totalorder %v73_v39, %v1128_v21  ;;  %vm192_vm2 = vcmp.eq.s32.totalorder %v121_v38, %v1128_v21  ;;  %vm191_vm5 = vcmp.eq.s32.totalorder %v121_v38, %v1125_v20 }
  0xa3   :  { %720 = vmatprep.mubr.msk.f32.mxu0 %vm160_vm0, %v882_v24 }
  0xa4   :  { %721 = vmatmul.mubr.msk.f32.gmra.mrb[16].mxu0 %vm159_vm15, %v882_v24  ;;  %751 = vmatmul.mubr.msk.f32.gmra.mrb[14].mxu1 %vm189_vm1, %v882_v24 }
  0xa5   :  { %v124_v40 = vpop.permute.xlu1 %123  ;;  %752 = vmatprep.mubr.msk.f32.mxu1 %vm192_vm2, %v882_v24  ;;  %v76_v41 = vpop.permute.xlu0 %75 }
  0xa6   :  { %vm161_vm3 = vcmp.eq.s32.totalorder %v76_v41, %v1125_v20  ;;  %vm162_vm4 = vcmp.eq.s32.totalorder %v76_v41, %v1128_v21  ;;  %vm194_vm6 = vcmp.eq.s32.totalorder %v124_v40, %v1128_v21  ;;  %vm193_vm9 = vcmp.eq.s32.totalorder %v124_v40, %v1125_v20 }
  0xa7   :  { %722 = vmatprep.mubr.msk.f32.mxu0 %vm162_vm4, %v882_v24 }
  0xa8   :  { %723 = vmatmul.mubr.msk.f32.gmra.mrb[18].mxu0 %vm161_vm3, %v882_v24  ;;  %753 = vmatmul.mubr.msk.f32.gmra.mrb[16].mxu1 %vm191_vm5, %v882_v24 }
  0xa9   :  { %v127_v42 = vpop.permute.xlu1 %126  ;;  %754 = vmatprep.mubr.msk.f32.mxu1 %vm194_vm6, %v882_v24  ;;  %v79_v43 = vpop.permute.xlu0 %78 }
  0xaa   :  { %vm163_vm7 = vcmp.eq.s32.totalorder %v79_v43, %v1125_v20  ;;  %vm164_vm8 = vcmp.eq.s32.totalorder %v79_v43, %v1128_v21  ;;  %vm196_vm10 = vcmp.eq.s32.totalorder %v127_v42, %v1128_v21  ;;  %vm195_vm13 = vcmp.eq.s32.totalorder %v127_v42, %v1125_v20 }
  0xab   :  { %724 = vmatprep.mubr.msk.f32.mxu0 %vm164_vm8, %v882_v24 }
  0xac   :  { %725 = vmatmul.mubr.msk.f32.gmra.mrb[20].mxu0 %vm163_vm7, %v882_v24  ;;  %755 = vmatmul.mubr.msk.f32.gmra.mrb[18].mxu1 %vm193_vm9, %v882_v24 }
  0xad   :  { %v130_v44 = vpop.permute.xlu1 %129  ;;  %756 = vmatprep.mubr.msk.f32.mxu1 %vm196_vm10, %v882_v24  ;;  %v82_v45 = vpop.permute.xlu0 %81 }
  0xae   :  { %vm165_vm11 = vcmp.eq.s32.totalorder %v82_v45, %v1125_v20  ;;  %vm166_vm12 = vcmp.eq.s32.totalorder %v82_v45, %v1128_v21  ;;  %vm198_vm14 = vcmp.eq.s32.totalorder %v130_v44, %v1128_v21  ;;  %vm197_vm1 = vcmp.eq.s32.totalorder %v130_v44, %v1125_v20 }
  0xaf   :  { %726 = vmatprep.mubr.msk.f32.mxu0 %vm166_vm12, %v882_v24 }
  0xb0   :  { %727 = vmatmul.mubr.msk.f32.gmra.mrb[22].mxu0 %vm165_vm11, %v882_v24  ;;  %757 = vmatmul.mubr.msk.f32.gmra.mrb[20].mxu1 %vm195_vm13, %v882_v24 }
  0xb1   :  { %v133_v46 = vpop.permute.xlu1 %132  ;;  %758 = vmatprep.mubr.msk.f32.mxu1 %vm198_vm14, %v882_v24  ;;  %v85_v47 = vpop.permute.xlu0 %84 }
  0xb2   :  { %vm167_vm15 = vcmp.eq.s32.totalorder %v85_v47, %v1125_v20  ;;  %vm168_vm0 = vcmp.eq.s32.totalorder %v85_v47, %v1128_v21  ;;  %vm200_vm2 = vcmp.eq.s32.totalorder %v133_v46, %v1128_v21  ;;  %vm199_vm5 = vcmp.eq.s32.totalorder %v133_v46, %v1125_v20 }
  0xb3   :  { %728 = vmatprep.mubr.msk.f32.mxu0 %vm168_vm0, %v882_v24 }
  0xb4   :  { %729 = vmatmul.mubr.msk.f32.gmra.mrb[24].mxu0 %vm167_vm15, %v882_v24  ;;  %759 = vmatmul.mubr.msk.f32.gmra.mrb[22].mxu1 %vm197_vm1, %v882_v24 }
  0xb5   :  { %v136_v48 = vpop.permute.xlu1 %135  ;;  %760 = vmatprep.mubr.msk.f32.mxu1 %vm200_vm2, %v882_v24  ;;  %v88_v49 = vpop.permute.xlu0 %87 }
  0xb6   :  { %vm169_vm3 = vcmp.eq.s32.totalorder %v88_v49, %v1125_v20  ;;  %vm170_vm4 = vcmp.eq.s32.totalorder %v88_v49, %v1128_v21  ;;  %vm202_vm6 = vcmp.eq.s32.totalorder %v136_v48, %v1128_v21  ;;  %vm201_vm9 = vcmp.eq.s32.totalorder %v136_v48, %v1125_v20 }
  0xb7   :  { %730 = vmatprep.mubr.msk.f32.mxu0 %vm170_vm4, %v882_v24 }
  0xb8   :  { %731 = vmatmul.mubr.msk.f32.gmra.mrb[26].mxu0 %vm169_vm3, %v882_v24  ;;  %761 = vmatmul.mubr.msk.f32.gmra.mrb[24].mxu1 %vm199_vm5, %v882_v24 }
  0xb9   :  { %v139_v50 = vpop.permute.xlu1 %138  ;;  %762 = vmatprep.mubr.msk.f32.mxu1 %vm202_vm6, %v882_v24  ;;  %v91_v51 = vpop.permute.xlu0 %90 }
  0xba   :  { %vm171_vm7 = vcmp.eq.s32.totalorder %v91_v51, %v1125_v20  ;;  %vm172_vm8 = vcmp.eq.s32.totalorder %v91_v51, %v1128_v21  ;;  %vm204_vm10 = vcmp.eq.s32.totalorder %v139_v50, %v1128_v21  ;;  %vm203_vm13 = vcmp.eq.s32.totalorder %v139_v50, %v1125_v20 }
  0xbb   :  { %732 = vmatprep.mubr.msk.f32.mxu0 %vm172_vm8, %v882_v24 }
  0xbc   :  { %733 = vmatmul.mubr.msk.f32.gmra.mrb[28].mxu0 %vm171_vm7, %v882_v24  ;;  %763 = vmatmul.mubr.msk.f32.gmra.mrb[26].mxu1 %vm201_vm9, %v882_v24 }
  0xbd   :  { %v142_v52 = vpop.permute.xlu1 %141  ;;  %764 = vmatprep.mubr.msk.f32.mxu1 %vm204_vm10, %v882_v24  ;;  %v94_v53 = vpop.permute.xlu0 %93 }
  0xbe   :  { %vm173_vm11 = vcmp.eq.s32.totalorder %v94_v53, %v1125_v20  ;;  %vm174_vm12 = vcmp.eq.s32.totalorder %v94_v53, %v1128_v21  ;;  %vm206_vm14 = vcmp.eq.s32.totalorder %v142_v52, %v1128_v21  ;;  %vm205_vm15 = vcmp.eq.s32.totalorder %v142_v52, %v1125_v20 }
  0xbf   :  { %734 = vmatprep.mubr.msk.f32.mxu0 %vm174_vm12, %v882_v24 }
  0xc0   :  { %735 = vmatmul.mubr.msk.f32.gmra.mrb[30].mxu0 %vm173_vm11, %v882_v24  ;;  %765 = vmatmul.mubr.msk.f32.gmra.mrb[28].mxu1 %vm203_vm13, %v882_v24 }
  0xc1   :  { %766 = vmatprep.mubr.msk.f32.mxu1 %vm206_vm14, %v882_v24 }
  0xc4   :  { %767 = vmatmul.mubr.msk.f32.gmra.mrb[30].mxu1 %vm205_vm15, %v882_v24 }
 0x157   :  { %v433_v54 = vpop.f32.mrb[0].mxu0 }
 0x158   :  { %592 = vst [vmem:[#allocation2] sm:$0xff] %v433_v54  ;;  %v435_v55 = vpop.f32.mrb[1].mxu0 }
 0x15b   :  { %v438_v56 = vpop.f32.mrb[2].mxu0  ;;  %v513_v57 = vpop.f32.mrb[0].mxu1 }
 0x15c   :  { %593 = vst [vmem:[#allocation2 + $0x8] sm:$0xff] %v438_v56  ;;  %608 = vst [vmem:[#allocation2 + $0x80] sm:$0xff] %v513_v57  ;;  %v440_v58 = vpop.f32.mrb[3].mxu0  ;;  %v515_v59 = vpop.f32.mrb[1].mxu1 }
 0x15f   :  { %v443_v60 = vpop.f32.mrb[4].mxu0  ;;  %v518_v61 = vpop.f32.mrb[2].mxu1 }
 0x160   :  { %594 = vst [vmem:[#allocation2 + $0x10] sm:$0xff] %v443_v60  ;;  %609 = vst [vmem:[#allocation2 + $0x88] sm:$0xff] %v518_v61  ;;  %v445_v62 = vpop.f32.mrb[5].mxu0  ;;  %v520_v63 = vpop.f32.mrb[3].mxu1 }
 0x163   :  { %v448_v0 = vpop.f32.mrb[6].mxu0  ;;  %v523_v1 = vpop.f32.mrb[4].mxu1 }
 0x164   :  { %595 = vst [vmem:[#allocation2 + $0x18] sm:$0xff] %v448_v0  ;;  %610 = vst [vmem:[#allocation2 + $0x90] sm:$0xff] %v523_v1  ;;  %v450_v2 = vpop.f32.mrb[7].mxu0  ;;  %v525_v3 = vpop.f32.mrb[5].mxu1 }
 0x167   :  { %v453_v4 = vpop.f32.mrb[8].mxu0  ;;  %v528_v6 = vpop.f32.mrb[6].mxu1 }
 0x168   :  { %596 = vst [vmem:[#allocation2 + $0x20] sm:$0xff] %v453_v4  ;;  %611 = vst [vmem:[#allocation2 + $0x98] sm:$0xff] %v528_v6  ;;  %v455_v7 = vpop.f32.mrb[9].mxu0  ;;  %v530_v8 = vpop.f32.mrb[7].mxu1 }
 0x16b   :  { %v458_v9 = vpop.f32.mrb[10].mxu0  ;;  %v533_v10 = vpop.f32.mrb[8].mxu1 }
 0x16c   :  { %597 = vst [vmem:[#allocation2 + $0x28] sm:$0xff] %v458_v9  ;;  %612 = vst [vmem:[#allocation2 + $0xa0] sm:$0xff] %v533_v10  ;;  %v460_v11 = vpop.f32.mrb[11].mxu0  ;;  %v535_v12 = vpop.f32.mrb[9].mxu1 }
 0x16f   :  { %v463_v13 = vpop.f32.mrb[12].mxu0  ;;  %v538_v14 = vpop.f32.mrb[10].mxu1 }
 0x170   :  { %598 = vst [vmem:[#allocation2 + $0x30] sm:$0xff] %v463_v13  ;;  %613 = vst [vmem:[#allocation2 + $0xa8] sm:$0xff] %v538_v14  ;;  %v465_v15 = vpop.f32.mrb[13].mxu0  ;;  %v540_v16 = vpop.f32.mrb[11].mxu1 }
 0x173   :  { %v468_v17 = vpop.f32.mrb[14].mxu0  ;;  %v543_v18 = vpop.f32.mrb[12].mxu1 }
 0x174   :  { %599 = vst [vmem:[#allocation2 + $0x38] sm:$0xff] %v468_v17  ;;  %614 = vst [vmem:[#allocation2 + $0xb0] sm:$0xff] %v543_v18  ;;  %v470_v19 = vpop.f32.mrb[15].mxu0  ;;  %v545_v20 = vpop.f32.mrb[13].mxu1 }
 0x177   :  { %v473_v21 = vpop.f32.mrb[16].mxu0  ;;  %v548_v22 = vpop.f32.mrb[14].mxu1 }
 0x178   :  { %600 = vst [vmem:[#allocation2 + $0x40] sm:$0xff] %v473_v21  ;;  %615 = vst [vmem:[#allocation2 + $0xb8] sm:$0xff] %v548_v22  ;;  %v475_v23 = vpop.f32.mrb[17].mxu0  ;;  %v550_v24 = vpop.f32.mrb[15].mxu1 }
 0x17b   :  { %v478_v5 = vpop.f32.mrb[18].mxu0  ;;  %v553_v25 = vpop.f32.mrb[16].mxu1 }
 0x17c   :  { %601 = vst [vmem:[#allocation2 + $0x48] sm:$0xff] %v478_v5  ;;  %616 = vst [vmem:[#allocation2 + $0xc0] sm:$0xff] %v553_v25  ;;  %v480_v26 = vpop.f32.mrb[19].mxu0  ;;  %v555_v27 = vpop.f32.mrb[17].mxu1 }
 0x17f   :  { %v483_v28 = vpop.f32.mrb[20].mxu0  ;;  %v558_v29 = vpop.f32.mrb[18].mxu1 }
 0x180   :  { %602 = vst [vmem:[#allocation2 + $0x50] sm:$0xff] %v483_v28  ;;  %617 = vst [vmem:[#allocation2 + $0xc8] sm:$0xff] %v558_v29  ;;  %v485_v30 = vpop.f32.mrb[21].mxu0  ;;  %v560_v31 = vpop.f32.mrb[19].mxu1 }
 0x183   :  { %v488_v32 = vpop.f32.mrb[22].mxu0  ;;  %v563_v33 = vpop.f32.mrb[20].mxu1 }
 0x184   :  { %603 = vst [vmem:[#allocation2 + $0x58] sm:$0xff] %v488_v32  ;;  %618 = vst [vmem:[#allocation2 + $0xd0] sm:$0xff] %v563_v33  ;;  %v490_v34 = vpop.f32.mrb[23].mxu0  ;;  %v565_v35 = vpop.f32.mrb[21].mxu1 }
 0x187   :  { %v493_v36 = vpop.f32.mrb[24].mxu0  ;;  %v568_v37 = vpop.f32.mrb[22].mxu1 }
 0x188   :  { %604 = vst [vmem:[#allocation2 + $0x60] sm:$0xff] %v493_v36  ;;  %619 = vst [vmem:[#allocation2 + $0xd8] sm:$0xff] %v568_v37  ;;  %v495_v38 = vpop.f32.mrb[25].mxu0  ;;  %v570_v39 = vpop.f32.mrb[23].mxu1 }
 0x18b   :  { %v498_v40 = vpop.f32.mrb[26].mxu0  ;;  %v573_v41 = vpop.f32.mrb[24].mxu1 }
 0x18c   :  { %605 = vst [vmem:[#allocation2 + $0x68] sm:$0xff] %v498_v40  ;;  %620 = vst [vmem:[#allocation2 + $0xe0] sm:$0xff] %v573_v41  ;;  %v500_v42 = vpop.f32.mrb[27].mxu0  ;;  %v575_v43 = vpop.f32.mrb[25].mxu1 }
 0x18f   :  { %v503_v44 = vpop.f32.mrb[28].mxu0  ;;  %v578_v45 = vpop.f32.mrb[26].mxu1 }
 0x190   :  { %606 = vst [vmem:[#allocation2 + $0x70] sm:$0xff] %v503_v44  ;;  %621 = vst [vmem:[#allocation2 + $0xe8] sm:$0xff] %v578_v45  ;;  %v505_v46 = vpop.f32.mrb[29].mxu0  ;;  %v580_v47 = vpop.f32.mrb[27].mxu1 }
 0x193   :  { %v508_v48 = vpop.f32.mrb[30].mxu0  ;;  %v583_v49 = vpop.f32.mrb[28].mxu1 }
 0x194   :  { %607 = vst [vmem:[#allocation2 + $0x78] sm:$0xff] %v508_v48  ;;  %622 = vst [vmem:[#allocation2 + $0xf0] sm:$0xff] %v583_v49  ;;  %v510_v50 = vpop.f32.mrb[31].mxu0  ;;  %v585_v51 = vpop.f32.mrb[29].mxu1 }
 0x197   :  { %v588_v52 = vpop.f32.mrb[30].mxu1 }
 0x198   :  { %623 = vst [vmem:[#allocation2 + $0xf8] sm:$0xff] %v588_v52  ;;  %v590_v53 = vpop.f32.mrb[31].mxu1 }
 0x199   :  { %867 = shalt.err (!%p864_p4)
}
 0x19a   :  { %s868_s28 = scalar_lea.hbm %s1272_s2, 4096 }
 0x19b   :  { %p869_p5 = scmp.ne.s32.totalorder %s1272_s2, %s868_s28  ;;  %p872_p6 = scmp.lt.u32.totalorder %s868_s28, %s1272_s2 }
 0x19d   :  { %p874_p7 = pnand %p872_p6, %p869_p5 }
 0x19f   :  { %877 = shalt.err (!%p874_p7)
}
 0x1a0   :  { %s884_s5 = smov 128   ;;  %s885_s6 = smov 8  }
 0x1a1   :  { %635 = dma.vmem_to_hbm [thread:$0]  %s630_s24, 4096, %s1272_s2, [#allocation3], %s884_s5, %s884_s5, %s885_s6  }
 0x1a2   :  { %878 = dma.done.wait [#allocation3], 4096  }
 0x1a3   :  { %879 = vsyncadd [#allocation3], 4294963200 }
 0x1a4   :  { %639 = vsyncpa [#allocation3], 1 }

</bundles_post_ra>
